<compile_context>
chip_gen: v6e
topology: v6e:2x2x1
jax: 0.10.0
libtpu: 0.0.40
codegen_flags: <defaults>
</compile_context>

<pallas_src>
import functools

import jax
import jax.numpy as jnp
from jax.experimental import pallas as pl
from jax.experimental.pallas import tpu as pltpu


def _round_up(x, m):
    return ((x + m - 1) // m) * m


# ----------------------------------------------------------------------------
# Pallas kernels
# ----------------------------------------------------------------------------
def _res_stack_kernel(x_ref, mask_ref, w1_ref, b1_ref, w2_ref, b2_ref,
                      out_ref, xpad_s, hpad_s, *, dilations):
    """All residual blocks, fused, for a block of BB batch elements.

    x_ref:    (BB, T, H) f32        mask_ref: (BB, T, 1) f32
    w1_ref:   (L, k, H, Cmid) bf16  b1_ref:   (L, 1, Cmid) f32
    w2_ref:   (L, k, Cmid, H) bf16  b2_ref:   (L, 1, H) f32
    out_ref:  (BB, T, H) bf16
    xpad_s:   (BB, PAD+T, H)   f32 scratch (rows [0, PAD) = causal left pad)
    hpad_s:   (BB, PAD+T, Cmid) f32 scratch
    """
    BB, T, H = x_ref.shape
    _, k, _, Cmid = w1_ref.shape
    PAD = xpad_s.shape[1] - T
    MT = BB * T

    # Zero only the causal-pad rows.  Done every grid step (cheap: PAD rows)
    # instead of once under pl.when(program_id==0): on 2-TC chips a parallel
    # grid split gives each core its own scratch and program_id offset, so a
    # once-only init would be skipped on the second core.
    if PAD > 0:
        xpad_s[:, 0:PAD, :] = jnp.zeros((BB, PAD, H), jnp.float32)
        hpad_s[:, 0:PAD, :] = jnp.zeros((BB, PAD, Cmid), jnp.float32)

    m = mask_ref[...]                                   # (BB, T, 1) f32
    x = x_ref[...] * m                                  # (BB, T, H) f32

    for l, d in enumerate(dilations):
        d2 = 2 * d

        # ---- conv1: causal dilated conv (dilation d) + ReLU ---------------
        # k accumulating MXU matmuls (no lane-axis concat of shifted slices).
        xpad_s[:, PAD:PAD + T, :] = x
        acc = None
        for j in range(k):
            off = PAD - (k - 1 - j) * d
            xs = xpad_s[:, off:off + T, :].reshape(MT, H).astype(jnp.bfloat16)
            p = jnp.dot(xs, w1_ref[l, j], preferred_element_type=jnp.float32)
            acc = p if acc is None else acc + p
        h = jnp.maximum(acc + b1_ref[l], 0.0)           # (MT, Cmid) f32

        # ---- conv2: causal dilated conv (dilation 2d) + ReLU --------------
        hpad_s[:, PAD:PAD + T, :] = h.reshape(BB, T, Cmid)
        acc = None
        for j in range(k):
            off = PAD - (k - 1 - j) * d2
            hs = hpad_s[:, off:off + T, :].reshape(MT, Cmid).astype(jnp.bfloat16)
            p = jnp.dot(hs, w2_ref[l, j], preferred_element_type=jnp.float32)
            acc = p if acc is None else acc + p
        y = jnp.maximum(acc + b2_ref[l], 0.0).reshape(BB, T, H)

        # ---- residual + mask (applied after the block, as in forward) -----
        x = (x + y) * m

    out_ref[...] = x.astype(out_ref.dtype)


def _fconv_kernel(x_ref, w_ref, b_ref, out_ref):
    """1x1 conv head tile: (TM, H) bf16 @ (H, TN) bf16 + bias -> (TM, TN) f32."""
    out_ref[...] = (jnp.dot(x_ref[...], w_ref[...],
                            preferred_element_type=jnp.float32) + b_ref[...])


# ----------------------------------------------------------------------------
# Wrappers around pallas_call
# ----------------------------------------------------------------------------
def residual_stack(x, mask, w1_all, b1_all, w2_all, b2_all, *, dilations):
    B, T, H = x.shape
    L, k, _, Cmid = w1_all.shape
    PAD = (k - 1) * 2 * max(dilations)     # worst-case causal left padding

    # Batch block: feed the MXU at least ~256 rows (BB*T) per matmul, capped
    # so the two causal-pad scratches stay well inside scoped VMEM.
    BB = min(max(1, -(-256 // T)), B)
    while BB > 1 and BB * (PAD + T) * (H + Cmid) * 4 > 6 * 1024 * 1024:
        BB -= 1

    Bp = _round_up(B, BB)
    if Bp != B:                             # pad batch; mask=0 keeps rows zero
        x = jnp.pad(x, ((0, Bp - B), (0, 0), (0, 0)))
        mask = jnp.pad(mask, ((0, Bp - B), (0, 0), (0, 0)))

    kern = functools.partial(_res_stack_kernel, dilations=tuple(dilations))
    out = pl.pallas_call(
        kern,
        out_shape=jax.ShapeDtypeStruct((Bp, T, H), jnp.bfloat16),
        grid=(Bp // BB,),
        in_specs=[
            pl.BlockSpec((BB, T, H), lambda b: (b, 0, 0)),           # x
            pl.BlockSpec((BB, T, 1), lambda b: (b, 0, 0)),           # mask
            pl.BlockSpec((L, k, H, Cmid), lambda b: (0, 0, 0, 0)),   # w1 (resident)
            pl.BlockSpec((L, 1, Cmid), lambda b: (0, 0, 0)),         # b1
            pl.BlockSpec((L, k, Cmid, H), lambda b: (0, 0, 0, 0)),   # w2 (resident)
            pl.BlockSpec((L, 1, H), lambda b: (0, 0, 0)),            # b2
        ],
        out_specs=pl.BlockSpec((BB, T, H), lambda b: (b, 0, 0)),
        scratch_shapes=[
            pltpu.VMEM((BB, PAD + T, H), jnp.float32),      # causal-padded x
            pltpu.VMEM((BB, PAD + T, Cmid), jnp.float32),   # causal-padded h
        ],
        compiler_params=pltpu.CompilerParams(dimension_semantics=("parallel",)),
    )(x, mask, w1_all, b1_all, w2_all, b2_all)
    return out[:B] if Bp != B else out


def fconv(x_bf, w_pad, b_pad, item_num):
    """1x1 conv head as a lane-dense tiled (B*T, H) @ (H, Npad) bf16 matmul."""
    B, T, H = x_bf.shape
    Np = w_pad.shape[1]
    M = B * T
    xf = x_bf.reshape(M, H)                       # contiguous reshape (free)

    # Large TM (>= TN for realistic M) so the streamed weight is read only
    # ceil(M/TM) times; pad M up to a multiple of TM instead of the old TM=M
    # fallback (which could exceed scoped VMEM).
    TM = min(512, _round_up(M, 8))
    Mp = _round_up(M, TM)
    if Mp != M:
        xf = jnp.pad(xf, ((0, Mp - M), (0, 0)))
    TN = 256 if Np % 256 == 0 else 128

    out = pl.pallas_call(
        _fconv_kernel,
        out_shape=jax.ShapeDtypeStruct((Mp, Np), jnp.float32),
        grid=(Mp // TM, Np // TN),               # N innermost: x tile resident
        in_specs=[
            pl.BlockSpec((TM, H), lambda i, j: (i, 0)),
            pl.BlockSpec((H, TN), lambda i, j: (0, j)),
            pl.BlockSpec((1, TN), lambda i, j: (0, j)),
        ],
        out_specs=pl.BlockSpec((TM, TN), lambda i, j: (i, j)),
        compiler_params=pltpu.CompilerParams(
            dimension_semantics=("parallel", "parallel")),
    )(xf, w_pad, b_pad)
    return out[:M, :item_num].reshape(B, T, item_num)


# ----------------------------------------------------------------------------
# NltNet model (Pallas version)
# ----------------------------------------------------------------------------
class NltNetPallas:
    def __init__(self, hidden_size, item_num, model_params, key):
        self.hidden_size = hidden_size
        self.item_num = item_num
        self.dilations = list(model_params["dilations"])
        self.kernel_size = int(model_params["kernel_size"])
        cmid = int(model_params["dilated_channels"])
        self.dilated_channels = cmid
        H, k, L = hidden_size, self.kernel_size, len(self.dilations)

        keys = jax.random.split(key, 2 + 2 * L)
        ki = iter(keys)

        # nn.Embedding(item_num + 1, hidden) with N(0, 0.01) init.
        self.emb_table = 0.01 * jax.random.normal(
            next(ki), (item_num + 1, H), jnp.float32)

        # Per-block f32 parameters (kept for the pure-JAX reference).
        self.blocks = []
        for _ in self.dilations:
            w1 = 0.1 * jax.random.normal(next(ki), (k, H, cmid), jnp.float32)
            b1 = jnp.zeros((1, cmid), jnp.float32)
            w2 = 0.1 * jax.random.normal(next(ki), (k, cmid, H), jnp.float32)
            b2 = jnp.zeros((1, H), jnp.float32)
            self.blocks.append((w1, b1, w2, b2))

        # Kernel-side packed parameters: per-tap weight matrices (k matmuls
        # accumulate in f32); matmul operands stored bf16.
        self.w1_all = jnp.stack(
            [w1 for (w1, _, _, _) in self.blocks]).astype(jnp.bfloat16)   # (L,k,H,Cmid)
        self.b1_all = jnp.stack([b1 for (_, b1, _, _) in self.blocks])    # (L,1,Cmid)
        self.w2_all = jnp.stack(
            [w2 for (_, _, w2, _) in self.blocks]).astype(jnp.bfloat16)   # (L,k,Cmid,H)
        self.b2_all = jnp.stack([b2 for (_, _, _, b2) in self.blocks])    # (L,1,H)

        # fconv: Conv2d(hidden -> item_num, kernel 1) == per-position linear.
        self.fconv_w = 0.1 * jax.random.normal(
            next(ki), (H, item_num), jnp.float32)
        self.fconv_b = jnp.zeros((1, item_num), jnp.float32)
        # Lane-dense padded copies for the kernel (item_num -> multiple of 128).
        self.n_pad = _round_up(item_num, 128)
        self.fconv_w_pad = jnp.pad(
            self.fconv_w, ((0, 0), (0, self.n_pad - item_num))
        ).astype(jnp.bfloat16)
        self.fconv_b_pad = jnp.pad(
            self.fconv_b, ((0, 0), (0, self.n_pad - item_num)))

    def __call__(self, inputs, inputs_lengths):
        # inputs: (B, T) int32; inputs_lengths unused (matches PyTorch forward).
        del inputs_lengths
        # TODO(synk): fuse the embedding gather + mask into the residual kernel
        #   (PrefetchScalarGridSpec) to skip the f32 activation HBM round trip.
        x = jnp.take(self.emb_table, inputs, axis=0)              # (B, T, H) f32
        mask = (inputs != self.item_num).astype(jnp.float32)[..., None]
        x = residual_stack(x, mask, self.w1_all, self.b1_all,
                           self.w2_all, self.b2_all,
                           dilations=self.dilations)              # (B, T, H) bf16
        return fconv(x, self.fconv_w_pad, self.fconv_b_pad,
                     self.item_num)                               # (B, T, item_num)


# ----------------------------------------------------------------------------
# Pure-JAX reference mirroring the kernel's bf16-matmul / f32-accumulate math
# ----------------------------------------------------------------------------
def reference_forward(model, inputs):
    k = model.kernel_size
    x = model.emb_table[inputs]                                   # (B, T, H) f32
    mask = (inputs != model.item_num).astype(jnp.float32)[..., None]
    x = x * mask
    _, T, _ = x.shape
    for (w1, b1, w2, b2), d in zip(model.blocks, model.dilations):
        d2 = 2 * d
        pad1, pad2 = (k - 1) * d, (k - 1) * d2
        xp = jnp.pad(x.astype(jnp.bfloat16), ((0, 0), (pad1, 0), (0, 0)))
        h = sum(jnp.einsum("btc,cd->btd", xp[:, j * d: j * d + T, :],
                           w1[j].astype(jnp.bfloat16),
                           preferred_element_type=jnp.float32)
                for j in range(k))
        h = jax.nn.relu(h + b1)
        hp = jnp.pad(h.astype(jnp.bfloat16), ((0, 0), (pad2, 0), (0, 0)))
        y = sum(jnp.einsum("btc,cd->btd", hp[:, j * d2: j * d2 + T, :],
                           w2[j].astype(jnp.bfloat16),
                           preferred_element_type=jnp.float32)
                for j in range(k))
        y = jax.nn.relu(y + b2)
        x = (x + y) * mask
    logits = jnp.einsum("bth,hn->btn", x.astype(jnp.bfloat16),
                        model.fconv_w.astype(jnp.bfloat16),
                        preferred_element_type=jnp.float32) + model.fconv_b
    return logits


# ----------------------------------------------------------------------------
if __name__ == "__main__":
    hidden_size = 32
    item_num = 20
    model_params = {"dilations": [1, 2], "dilated_channels": 32, "kernel_size": 3}
    B, T = 2, 8

    root = jax.random.PRNGKey(0)
    k_model, k_in = jax.random.split(root)

    model = NltNetPallas(hidden_size, item_num, model_params, k_model)

    inputs = jax.random.randint(k_in, (B, T), 0, item_num + 1, dtype=jnp.int32)
    inputs_lengths = jnp.full((B,), T, dtype=jnp.int32)

    out = jax.block_until_ready(model(inputs, inputs_lengths))
    ref = jax.block_until_ready(reference_forward(model, inputs))

    assert out.shape == (B, T, item_num), out.shape
    assert jnp.allclose(out, ref, atol=1e-3, rtol=1e-3), (
        "mismatch vs reference, max abs diff = "
        + str(float(jnp.max(jnp.abs(out - ref)))))

    print("KERNEL_OK")
</pallas_src>

<mosaic_0001>
module attributes {stable_mosaic.version = 11 : i64} {
  func.func @_res_stack_kernel(%arg0: i32, %arg1: memref<2x8x32xf32, #tpu.memory_space<vmem>>, %arg2: memref<2x8x1xf32, #tpu.memory_space<vmem>>, %arg3: memref<2x3x32x32xbf16, #tpu.memory_space<vmem>>, %arg4: memref<2x1x32xf32, #tpu.memory_space<vmem>>, %arg5: memref<2x3x32x32xbf16, #tpu.memory_space<vmem>>, %arg6: memref<2x1x32xf32, #tpu.memory_space<vmem>>, %arg7: memref<2x8x32xbf16, #tpu.memory_space<vmem>>, %arg8: memref<2x16x32xf32, #tpu.memory_space<vmem>>, %arg9: memref<2x16x32xf32, #tpu.memory_space<vmem>>) attributes {dimension_semantics = [#tpu.dimension_semantics<parallel>], iteration_bounds = array<i64: 1>, scalar_prefetch = 0 : i64, scratch_operands = 2 : i64, tpu.core_type = #tpu.core_type<tc>, window_params = [{transform_indices = @transform_0, window_bounds = array<i64: 2, 8, 32>}, {transform_indices = @transform_1, window_bounds = array<i64: 2, 8, 1>}, {pipeline_mode = #tpu.pipeline_mode<synchronous>, transform_indices = @transform_2, window_bounds = array<i64: 2, 3, 32, 32>}, {pipeline_mode = #tpu.pipeline_mode<synchronous>, transform_indices = @transform_3, window_bounds = array<i64: 2, 1, 32>}, {pipeline_mode = #tpu.pipeline_mode<synchronous>, transform_indices = @transform_4, window_bounds = array<i64: 2, 3, 32, 32>}, {pipeline_mode = #tpu.pipeline_mode<synchronous>, transform_indices = @transform_5, window_bounds = array<i64: 2, 1, 32>}, {transform_indices = @transform_6, window_bounds = array<i64: 2, 8, 32>}]} {
    %cst = arith.constant 0.000000e+00 : f32
    %0 = vector.broadcast %cst : f32 to vector<2x8x32xf32>
    %c0 = arith.constant 0 : index
    %c0_0 = arith.constant 0 : index
    %c0_1 = arith.constant 0 : index
    %1 = vector.load %arg8[%c0, %c0_0, %c0_1] : memref<2x16x32xf32, #tpu.memory_space<vmem>>, vector<2x8x32xf32>
    tpu.vector_store %arg8[%c0, %c0_0, %c0_1], %0 {strides = array<i32>} : memref<2x16x32xf32, #tpu.memory_space<vmem>>, vector<2x8x32xf32>,
    %cst_2 = arith.constant 0.000000e+00 : f32
    %2 = vector.broadcast %cst_2 : f32 to vector<2x8x32xf32>
    %c0_3 = arith.constant 0 : index
    %c0_4 = arith.constant 0 : index
    %c0_5 = arith.constant 0 : index
    %3 = vector.load %arg9[%c0_3, %c0_4, %c0_5] : memref<2x16x32xf32, #tpu.memory_space<vmem>>, vector<2x8x32xf32>
    tpu.vector_store %arg9[%c0_3, %c0_4, %c0_5], %2 {strides = array<i32>} : memref<2x16x32xf32, #tpu.memory_space<vmem>>, vector<2x8x32xf32>,
    %c0_6 = arith.constant 0 : index
    %c0_7 = arith.constant 0 : index
    %c0_8 = arith.constant 0 : index
    %4 = vector.load %arg2[%c0_6, %c0_7, %c0_8] : memref<2x8x1xf32, #tpu.memory_space<vmem>>, vector<2x8x1xf32>
    %c0_9 = arith.constant 0 : index
    %c0_10 = arith.constant 0 : index
    %c0_11 = arith.constant 0 : index
    %5 = vector.load %arg1[%c0_9, %c0_10, %c0_11] : memref<2x8x32xf32, #tpu.memory_space<vmem>>, vector<2x8x32xf32>
    %6 = vector.broadcast %4 : vector<2x8x1xf32> to vector<2x8x32xf32>
    %7 = arith.mulf %5, %6 : vector<2x8x32xf32>
    %c0_12 = arith.constant 0 : index
    %c8 = arith.constant 8 : index
    %c0_13 = arith.constant 0 : index
    %8 = vector.load %arg8[%c0_12, %c8, %c0_13] : memref<2x16x32xf32, #tpu.memory_space<vmem>>, vector<2x8x32xf32>
    tpu.vector_store %arg8[%c0_12, %c8, %c0_13], %7 {strides = array<i32>} : memref<2x16x32xf32, #tpu.memory_space<vmem>>, vector<2x8x32xf32>,
    %c0_14 = arith.constant 0 : index
    %c6 = arith.constant 6 : index
    %c0_15 = arith.constant 0 : index
    %9 = vector.load %arg8[%c0_14, %c6, %c0_15] : memref<2x16x32xf32, #tpu.memory_space<vmem>>, vector<2x8x32xf32>
    %10 = vector.shape_cast %9 : vector<2x8x32xf32> to vector<16x32xf32>
    %11 = arith.truncf %10 : vector<16x32xf32> to vector<16x32xbf16>
    %c0_16 = arith.constant 0 : index
    %c0_17 = arith.constant 0 : index
    %c0_18 = arith.constant 0 : index
    %c0_19 = arith.constant 0 : index
    %12 = vector.load %arg3[%c0_16, %c0_17, %c0_18, %c0_19] : memref<2x3x32x32xbf16, #tpu.memory_space<vmem>>, vector<1x1x32x32xbf16>
    %13 = vector.shape_cast %12 : vector<1x1x32x32xbf16> to vector<32x32xbf16>
    %cst_20 = arith.constant dense<0.000000e+00> : vector<16x32xf32>
    %14 = tpu.matmul %11, %13, %cst_20 {dimension_numbers = #tpu.dot_dimension_numbers<[1], [0], [0], [1], [0, 0, 1, 1], [], []>} : vector<16x32xbf16>, vector<32x32xbf16>, vector<16x32xf32> -> vector<16x32xf32>
    %c0_21 = arith.constant 0 : index
    %c7 = arith.constant 7 : index
    %c0_22 = arith.constant 0 : index
    %15 = vector.load %arg8[%c0_21, %c7, %c0_22] : memref<2x16x32xf32, #tpu.memory_space<vmem>>, vector<2x8x32xf32>
    %16 = vector.shape_cast %15 : vector<2x8x32xf32> to vector<16x32xf32>
    %17 = arith.truncf %16 : vector<16x32xf32> to vector<16x32xbf16>
    %c0_23 = arith.constant 0 : index
    %c1 = arith.constant 1 : index
    %c0_24 = arith.constant 0 : index
    %c0_25 = arith.constant 0 : index
    %18 = vector.load %arg3[%c0_23, %c1, %c0_24, %c0_25] : memref<2x3x32x32xbf16, #tpu.memory_space<vmem>>, vector<1x1x32x32xbf16>
    %19 = vector.shape_cast %18 : vector<1x1x32x32xbf16> to vector<32x32xbf16>
    %cst_26 = arith.constant dense<0.000000e+00> : vector<16x32xf32>
    %20 = tpu.matmul %17, %19, %cst_26 {dimension_numbers = #tpu.dot_dimension_numbers<[1], [0], [0], [1], [0, 0, 1, 1], [], []>} : vector<16x32xbf16>, vector<32x32xbf16>, vector<16x32xf32> -> vector<16x32xf32>
    %21 = arith.addf %14, %20 : vector<16x32xf32>
    %c0_27 = arith.constant 0 : index
    %c8_28 = arith.constant 8 : index
    %c0_29 = arith.constant 0 : index
    %22 = vector.load %arg8[%c0_27, %c8_28, %c0_29] : memref<2x16x32xf32, #tpu.memory_space<vmem>>, vector<2x8x32xf32>
    %23 = vector.shape_cast %22 : vector<2x8x32xf32> to vector<16x32xf32>
    %24 = arith.truncf %23 : vector<16x32xf32> to vector<16x32xbf16>
    %c0_30 = arith.constant 0 : index
    %c2 = arith.constant 2 : index
    %c0_31 = arith.constant 0 : index
    %c0_32 = arith.constant 0 : index
    %25 = vector.load %arg3[%c0_30, %c2, %c0_31, %c0_32] : memref<2x3x32x32xbf16, #tpu.memory_space<vmem>>, vector<1x1x32x32xbf16>
    %26 = vector.shape_cast %25 : vector<1x1x32x32xbf16> to vector<32x32xbf16>
    %cst_33 = arith.constant dense<0.000000e+00> : vector<16x32xf32>
    %27 = tpu.matmul %24, %26, %cst_33 {dimension_numbers = #tpu.dot_dimension_numbers<[1], [0], [0], [1], [0, 0, 1, 1], [], []>} : vector<16x32xbf16>, vector<32x32xbf16>, vector<16x32xf32> -> vector<16x32xf32>
    %28 = arith.addf %21, %27 : vector<16x32xf32>
    %c0_34 = arith.constant 0 : index
    %c0_35 = arith.constant 0 : index
    %c0_36 = arith.constant 0 : index
    %29 = vector.load %arg4[%c0_34, %c0_35, %c0_36] : memref<2x1x32xf32, #tpu.memory_space<vmem>>, vector<1x1x32xf32>
    %30 = vector.shape_cast %29 : vector<1x1x32xf32> to vector<1x32xf32>
    %31 = vector.broadcast %30 : vector<1x32xf32> to vector<16x32xf32>
    %32 = arith.addf %28, %31 : vector<16x32xf32>
    %cst_37 = arith.constant 0.000000e+00 : f32
    %33 = vector.broadcast %cst_37 : f32 to vector<16x32xf32>
    %34 = arith.maximumf %32, %33 : vector<16x32xf32>
    %35 = vector.shape_cast %34 : vector<16x32xf32> to vector<2x8x32xf32>
    %c0_38 = arith.constant 0 : index
    %c8_39 = arith.constant 8 : index
    %c0_40 = arith.constant 0 : index
    %36 = vector.load %arg9[%c0_38, %c8_39, %c0_40] : memref<2x16x32xf32, #tpu.memory_space<vmem>>, vector<2x8x32xf32>
    tpu.vector_store %arg9[%c0_38, %c8_39, %c0_40], %35 {strides = array<i32>} : memref<2x16x32xf32, #tpu.memory_space<vmem>>, vector<2x8x32xf32>,
    %c0_41 = arith.constant 0 : index
    %c4 = arith.constant 4 : index
    %c0_42 = arith.constant 0 : index
    %37 = vector.load %arg9[%c0_41, %c4, %c0_42] : memref<2x16x32xf32, #tpu.memory_space<vmem>>, vector<2x8x32xf32>
    %38 = vector.shape_cast %37 : vector<2x8x32xf32> to vector<16x32xf32>
    %39 = arith.truncf %38 : vector<16x32xf32> to vector<16x32xbf16>
    %c0_43 = arith.constant 0 : index
    %c0_44 = arith.constant 0 : index
    %c0_45 = arith.constant 0 : index
    %c0_46 = arith.constant 0 : index
    %40 = vector.load %arg5[%c0_43, %c0_44, %c0_45, %c0_46] : memref<2x3x32x32xbf16, #tpu.memory_space<vmem>>, vector<1x1x32x32xbf16>
    %41 = vector.shape_cast %40 : vector<1x1x32x32xbf16> to vector<32x32xbf16>
    %cst_47 = arith.constant dense<0.000000e+00> : vector<16x32xf32>
    %42 = tpu.matmul %39, %41, %cst_47 {dimension_numbers = #tpu.dot_dimension_numbers<[1], [0], [0], [1], [0, 0, 1, 1], [], []>} : vector<16x32xbf16>, vector<32x32xbf16>, vector<16x32xf32> -> vector<16x32xf32>
    %c0_48 = arith.constant 0 : index
    %c6_49 = arith.constant 6 : index
    %c0_50 = arith.constant 0 : index
    %43 = vector.load %arg9[%c0_48, %c6_49, %c0_50] : memref<2x16x32xf32, #tpu.memory_space<vmem>>, vector<2x8x32xf32>
    %44 = vector.shape_cast %43 : vector<2x8x32xf32> to vector<16x32xf32>
    %45 = arith.truncf %44 : vector<16x32xf32> to vector<16x32xbf16>
    %c0_51 = arith.constant 0 : index
    %c1_52 = arith.constant 1 : index
    %c0_53 = arith.constant 0 : index
    %c0_54 = arith.constant 0 : index
    %46 = vector.load %arg5[%c0_51, %c1_52, %c0_53, %c0_54] : memref<2x3x32x32xbf16, #tpu.memory_space<vmem>>, vector<1x1x32x32xbf16>
    %47 = vector.shape_cast %46 : vector<1x1x32x32xbf16> to vector<32x32xbf16>
    %cst_55 = arith.constant dense<0.000000e+00> : vector<16x32xf32>
    %48 = tpu.matmul %45, %47, %cst_55 {dimension_numbers = #tpu.dot_dimension_numbers<[1], [0], [0], [1], [0, 0, 1, 1], [], []>} : vector<16x32xbf16>, vector<32x32xbf16>, vector<16x32xf32> -> vector<16x32xf32>
    %49 = arith.addf %42, %48 : vector<16x32xf32>
    %c0_56 = arith.constant 0 : index
    %c8_57 = arith.constant 8 : index
    %c0_58 = arith.constant 0 : index
    %50 = vector.load %arg9[%c0_56, %c8_57, %c0_58] : memref<2x16x32xf32, #tpu.memory_space<vmem>>, vector<2x8x32xf32>
    %51 = vector.shape_cast %50 : vector<2x8x32xf32> to vector<16x32xf32>
    %52 = arith.truncf %51 : vector<16x32xf32> to vector<16x32xbf16>
    %c0_59 = arith.constant 0 : index
    %c2_60 = arith.constant 2 : index
    %c0_61 = arith.constant 0 : index
    %c0_62 = arith.constant 0 : index
    %53 = vector.load %arg5[%c0_59, %c2_60, %c0_61, %c0_62] : memref<2x3x32x32xbf16, #tpu.memory_space<vmem>>, vector<1x1x32x32xbf16>
    %54 = vector.shape_cast %53 : vector<1x1x32x32xbf16> to vector<32x32xbf16>
    %cst_63 = arith.constant dense<0.000000e+00> : vector<16x32xf32>
    %55 = tpu.matmul %52, %54, %cst_63 {dimension_numbers = #tpu.dot_dimension_numbers<[1], [0], [0], [1], [0, 0, 1, 1], [], []>} : vector<16x32xbf16>, vector<32x32xbf16>, vector<16x32xf32> -> vector<16x32xf32>
    %56 = arith.addf %49, %55 : vector<16x32xf32>
    %c0_64 = arith.constant 0 : index
    %c0_65 = arith.constant 0 : index
    %c0_66 = arith.constant 0 : index
    %57 = vector.load %arg6[%c0_64, %c0_65, %c0_66] : memref<2x1x32xf32, #tpu.memory_space<vmem>>, vector<1x1x32xf32>
    %58 = vector.shape_cast %57 : vector<1x1x32xf32> to vector<1x32xf32>
    %59 = vector.broadcast %58 : vector<1x32xf32> to vector<16x32xf32>
    %60 = arith.addf %56, %59 : vector<16x32xf32>
    %cst_67 = arith.constant 0.000000e+00 : f32
    %61 = vector.broadcast %cst_67 : f32 to vector<16x32xf32>
    %62 = arith.maximumf %60, %61 : vector<16x32xf32>
    %63 = vector.shape_cast %62 : vector<16x32xf32> to vector<2x8x32xf32>
    %64 = arith.addf %7, %63 : vector<2x8x32xf32>
    %65 = vector.broadcast %4 : vector<2x8x1xf32> to vector<2x8x32xf32>
    %66 = arith.mulf %64, %65 : vector<2x8x32xf32>
    %c0_68 = arith.constant 0 : index
    %c8_69 = arith.constant 8 : index
    %c0_70 = arith.constant 0 : index
    %67 = vector.load %arg8[%c0_68, %c8_69, %c0_70] : memref<2x16x32xf32, #tpu.memory_space<vmem>>, vector<2x8x32xf32>
    tpu.vector_store %arg8[%c0_68, %c8_69, %c0_70], %66 {strides = array<i32>} : memref<2x16x32xf32, #tpu.memory_space<vmem>>, vector<2x8x32xf32>,
    %c0_71 = arith.constant 0 : index
    %c4_72 = arith.constant 4 : index
    %c0_73 = arith.constant 0 : index
    %68 = vector.load %arg8[%c0_71, %c4_72, %c0_73] : memref<2x16x32xf32, #tpu.memory_space<vmem>>, vector<2x8x32xf32>
    %69 = vector.shape_cast %68 : vector<2x8x32xf32> to vector<16x32xf32>
    %70 = arith.truncf %69 : vector<16x32xf32> to vector<16x32xbf16>
    %c1_74 = arith.constant 1 : index
    %c0_75 = arith.constant 0 : index
    %c0_76 = arith.constant 0 : index
    %c0_77 = arith.constant 0 : index
    %71 = vector.load %arg3[%c1_74, %c0_75, %c0_76, %c0_77] : memref<2x3x32x32xbf16, #tpu.memory_space<vmem>>, vector<1x1x32x32xbf16>
    %72 = vector.shape_cast %71 : vector<1x1x32x32xbf16> to vector<32x32xbf16>
    %cst_78 = arith.constant dense<0.000000e+00> : vector<16x32xf32>
    %73 = tpu.matmul %70, %72, %cst_78 {dimension_numbers = #tpu.dot_dimension_numbers<[1], [0], [0], [1], [0, 0, 1, 1], [], []>} : vector<16x32xbf16>, vector<32x32xbf16>, vector<16x32xf32> -> vector<16x32xf32>
    %c0_79 = arith.constant 0 : index
    %c6_80 = arith.constant 6 : index
    %c0_81 = arith.constant 0 : index
    %74 = vector.load %arg8[%c0_79, %c6_80, %c0_81] : memref<2x16x32xf32, #tpu.memory_space<vmem>>, vector<2x8x32xf32>
    %75 = vector.shape_cast %74 : vector<2x8x32xf32> to vector<16x32xf32>
    %76 = arith.truncf %75 : vector<16x32xf32> to vector<16x32xbf16>
    %c1_82 = arith.constant 1 : index
    %c1_83 = arith.constant 1 : index
    %c0_84 = arith.constant 0 : index
    %c0_85 = arith.constant 0 : index
    %77 = vector.load %arg3[%c1_82, %c1_83, %c0_84, %c0_85] : memref<2x3x32x32xbf16, #tpu.memory_space<vmem>>, vector<1x1x32x32xbf16>
    %78 = vector.shape_cast %77 : vector<1x1x32x32xbf16> to vector<32x32xbf16>
    %cst_86 = arith.constant dense<0.000000e+00> : vector<16x32xf32>
    %79 = tpu.matmul %76, %78, %cst_86 {dimension_numbers = #tpu.dot_dimension_numbers<[1], [0], [0], [1], [0, 0, 1, 1], [], []>} : vector<16x32xbf16>, vector<32x32xbf16>, vector<16x32xf32> -> vector<16x32xf32>
    %80 = arith.addf %73, %79 : vector<16x32xf32>
    %c0_87 = arith.constant 0 : index
    %c8_88 = arith.constant 8 : index
    %c0_89 = arith.constant 0 : index
    %81 = vector.load %arg8[%c0_87, %c8_88, %c0_89] : memref<2x16x32xf32, #tpu.memory_space<vmem>>, vector<2x8x32xf32>
    %82 = vector.shape_cast %81 : vector<2x8x32xf32> to vector<16x32xf32>
    %83 = arith.truncf %82 : vector<16x32xf32> to vector<16x32xbf16>
    %c1_90 = arith.constant 1 : index
    %c2_91 = arith.constant 2 : index
    %c0_92 = arith.constant 0 : index
    %c0_93 = arith.constant 0 : index
    %84 = vector.load %arg3[%c1_90, %c2_91, %c0_92, %c0_93] : memref<2x3x32x32xbf16, #tpu.memory_space<vmem>>, vector<1x1x32x32xbf16>
    %85 = vector.shape_cast %84 : vector<1x1x32x32xbf16> to vector<32x32xbf16>
    %cst_94 = arith.constant dense<0.000000e+00> : vector<16x32xf32>
    %86 = tpu.matmul %83, %85, %cst_94 {dimension_numbers = #tpu.dot_dimension_numbers<[1], [0], [0], [1], [0, 0, 1, 1], [], []>} : vector<16x32xbf16>, vector<32x32xbf16>, vector<16x32xf32> -> vector<16x32xf32>
    %87 = arith.addf %80, %86 : vector<16x32xf32>
    %c1_95 = arith.constant 1 : index
    %c0_96 = arith.constant 0 : index
    %c0_97 = arith.constant 0 : index
    %88 = vector.load %arg4[%c1_95, %c0_96, %c0_97] : memref<2x1x32xf32, #tpu.memory_space<vmem>>, vector<1x1x32xf32>
    %89 = vector.shape_cast %88 : vector<1x1x32xf32> to vector<1x32xf32>
    %90 = vector.broadcast %89 : vector<1x32xf32> to vector<16x32xf32>
    %91 = arith.addf %87, %90 : vector<16x32xf32>
    %cst_98 = arith.constant 0.000000e+00 : f32
    %92 = vector.broadcast %cst_98 : f32 to vector<16x32xf32>
    %93 = arith.maximumf %91, %92 : vector<16x32xf32>
    %94 = vector.shape_cast %93 : vector<16x32xf32> to vector<2x8x32xf32>
    %c0_99 = arith.constant 0 : index
    %c8_100 = arith.constant 8 : index
    %c0_101 = arith.constant 0 : index
    %95 = vector.load %arg9[%c0_99, %c8_100, %c0_101] : memref<2x16x32xf32, #tpu.memory_space<vmem>>, vector<2x8x32xf32>
    tpu.vector_store %arg9[%c0_99, %c8_100, %c0_101], %94 {strides = array<i32>} : memref<2x16x32xf32, #tpu.memory_space<vmem>>, vector<2x8x32xf32>,
    %c0_102 = arith.constant 0 : index
    %c0_103 = arith.constant 0 : index
    %c0_104 = arith.constant 0 : index
    %96 = vector.load %arg9[%c0_102, %c0_103, %c0_104] : memref<2x16x32xf32, #tpu.memory_space<vmem>>, vector<2x8x32xf32>
    %97 = vector.shape_cast %96 : vector<2x8x32xf32> to vector<16x32xf32>
    %98 = arith.truncf %97 : vector<16x32xf32> to vector<16x32xbf16>
    %c1_105 = arith.constant 1 : index
    %c0_106 = arith.constant 0 : index
    %c0_107 = arith.constant 0 : index
    %c0_108 = arith.constant 0 : index
    %99 = vector.load %arg5[%c1_105, %c0_106, %c0_107, %c0_108] : memref<2x3x32x32xbf16, #tpu.memory_space<vmem>>, vector<1x1x32x32xbf16>
    %100 = vector.shape_cast %99 : vector<1x1x32x32xbf16> to vector<32x32xbf16>
    %cst_109 = arith.constant dense<0.000000e+00> : vector<16x32xf32>
    %101 = tpu.matmul %98, %100, %cst_109 {dimension_numbers = #tpu.dot_dimension_numbers<[1], [0], [0], [1], [0, 0, 1, 1], [], []>} : vector<16x32xbf16>, vector<32x32xbf16>, vector<16x32xf32> -> vector<16x32xf32>
    %c0_110 = arith.constant 0 : index
    %c4_111 = arith.constant 4 : index
    %c0_112 = arith.constant 0 : index
    %102 = vector.load %arg9[%c0_110, %c4_111, %c0_112] : memref<2x16x32xf32, #tpu.memory_space<vmem>>, vector<2x8x32xf32>
    %103 = vector.shape_cast %102 : vector<2x8x32xf32> to vector<16x32xf32>
    %104 = arith.truncf %103 : vector<16x32xf32> to vector<16x32xbf16>
    %c1_113 = arith.constant 1 : index
    %c1_114 = arith.constant 1 : index
    %c0_115 = arith.constant 0 : index
    %c0_116 = arith.constant 0 : index
    %105 = vector.load %arg5[%c1_113, %c1_114, %c0_115, %c0_116] : memref<2x3x32x32xbf16, #tpu.memory_space<vmem>>, vector<1x1x32x32xbf16>
    %106 = vector.shape_cast %105 : vector<1x1x32x32xbf16> to vector<32x32xbf16>
    %cst_117 = arith.constant dense<0.000000e+00> : vector<16x32xf32>
    %107 = tpu.matmul %104, %106, %cst_117 {dimension_numbers = #tpu.dot_dimension_numbers<[1], [0], [0], [1], [0, 0, 1, 1], [], []>} : vector<16x32xbf16>, vector<32x32xbf16>, vector<16x32xf32> -> vector<16x32xf32>
    %108 = arith.addf %101, %107 : vector<16x32xf32>
    %c0_118 = arith.constant 0 : index
    %c8_119 = arith.constant 8 : index
    %c0_120 = arith.constant 0 : index
    %109 = vector.load %arg9[%c0_118, %c8_119, %c0_120] : memref<2x16x32xf32, #tpu.memory_space<vmem>>, vector<2x8x32xf32>
    %110 = vector.shape_cast %109 : vector<2x8x32xf32> to vector<16x32xf32>
    %111 = arith.truncf %110 : vector<16x32xf32> to vector<16x32xbf16>
    %c1_121 = arith.constant 1 : index
    %c2_122 = arith.constant 2 : index
    %c0_123 = arith.constant 0 : index
    %c0_124 = arith.constant 0 : index
    %112 = vector.load %arg5[%c1_121, %c2_122, %c0_123, %c0_124] : memref<2x3x32x32xbf16, #tpu.memory_space<vmem>>, vector<1x1x32x32xbf16>
    %113 = vector.shape_cast %112 : vector<1x1x32x32xbf16> to vector<32x32xbf16>
    %cst_125 = arith.constant dense<0.000000e+00> : vector<16x32xf32>
    %114 = tpu.matmul %111, %113, %cst_125 {dimension_numbers = #tpu.dot_dimension_numbers<[1], [0], [0], [1], [0, 0, 1, 1], [], []>} : vector<16x32xbf16>, vector<32x32xbf16>, vector<16x32xf32> -> vector<16x32xf32>
    %115 = arith.addf %108, %114 : vector<16x32xf32>
    %c1_126 = arith.constant 1 : index
    %c0_127 = arith.constant 0 : index
    %c0_128 = arith.constant 0 : index
    %116 = vector.load %arg6[%c1_126, %c0_127, %c0_128] : memref<2x1x32xf32, #tpu.memory_space<vmem>>, vector<1x1x32xf32>
    %117 = vector.shape_cast %116 : vector<1x1x32xf32> to vector<1x32xf32>
    %118 = vector.broadcast %117 : vector<1x32xf32> to vector<16x32xf32>
    %119 = arith.addf %115, %118 : vector<16x32xf32>
    %cst_129 = arith.constant 0.000000e+00 : f32
    %120 = vector.broadcast %cst_129 : f32 to vector<16x32xf32>
    %121 = arith.maximumf %119, %120 : vector<16x32xf32>
    %122 = vector.shape_cast %121 : vector<16x32xf32> to vector<2x8x32xf32>
    %123 = arith.addf %66, %122 : vector<2x8x32xf32>
    %124 = vector.broadcast %4 : vector<2x8x1xf32> to vector<2x8x32xf32>
    %125 = arith.mulf %123, %124 : vector<2x8x32xf32>
    %126 = arith.truncf %125 : vector<2x8x32xf32> to vector<2x8x32xbf16>
    %c0_130 = arith.constant 0 : index
    %c0_131 = arith.constant 0 : index
    %c0_132 = arith.constant 0 : index
    %127 = vector.load %arg7[%c0_130, %c0_131, %c0_132] : memref<2x8x32xbf16, #tpu.memory_space<vmem>>, vector<2x8x32xbf16>
    tpu.vector_store %arg7[%c0_130, %c0_131, %c0_132], %126 {strides = array<i32>} : memref<2x8x32xbf16, #tpu.memory_space<vmem>>, vector<2x8x32xbf16>,
    return
  }
  func.func @transform_0(%arg0: i32) -> (i32, i32, i32) {
    %c0_i32 = arith.constant 0 : i32
    %c0_i32_0 = arith.constant 0 : i32
    %c0_i32_1 = arith.constant 0 : i32
    return %arg0, %c0_i32, %c0_i32_0 : i32, i32, i32
  }
  func.func @transform_1(%arg0: i32) -> (i32, i32, i32) {
    %c0_i32 = arith.constant 0 : i32
    %c0_i32_0 = arith.constant 0 : i32
    %c0_i32_1 = arith.constant 0 : i32
    return %arg0, %c0_i32, %c0_i32_0 : i32, i32, i32
  }
  func.func @transform_2(%arg0: i32) -> (i32, i32, i32, i32) {
    %c0_i32 = arith.constant 0 : i32
    %c0_i32_0 = arith.constant 0 : i32
    %c0_i32_1 = arith.constant 0 : i32
    %c0_i32_2 = arith.constant 0 : i32
    %c0_i32_3 = arith.constant 0 : i32
    return %c0_i32, %c0_i32_0, %c0_i32_1, %c0_i32_2 : i32, i32, i32, i32
  }
  func.func @transform_3(%arg0: i32) -> (i32, i32, i32) {
    %c0_i32 = arith.constant 0 : i32
    %c0_i32_0 = arith.constant 0 : i32
    %c0_i32_1 = arith.constant 0 : i32
    %c0_i32_2 = arith.constant 0 : i32
    return %c0_i32, %c0_i32_0, %c0_i32_1 : i32, i32, i32
  }
  func.func @transform_4(%arg0: i32) -> (i32, i32, i32, i32) {
    %c0_i32 = arith.constant 0 : i32
    %c0_i32_0 = arith.constant 0 : i32
    %c0_i32_1 = arith.constant 0 : i32
    %c0_i32_2 = arith.constant 0 : i32
    %c0_i32_3 = arith.constant 0 : i32
    return %c0_i32, %c0_i32_0, %c0_i32_1, %c0_i32_2 : i32, i32, i32, i32
  }
  func.func @transform_5(%arg0: i32) -> (i32, i32, i32) {
    %c0_i32 = arith.constant 0 : i32
    %c0_i32_0 = arith.constant 0 : i32
    %c0_i32_1 = arith.constant 0 : i32
    %c0_i32_2 = arith.constant 0 : i32
    return %c0_i32, %c0_i32_0, %c0_i32_1 : i32, i32, i32
  }
  func.func @transform_6(%arg0: i32) -> (i32, i32, i32) {
    %c0_i32 = arith.constant 0 : i32
    %c0_i32_0 = arith.constant 0 : i32
    %c0_i32_1 = arith.constant 0 : i32
    return %arg0, %c0_i32, %c0_i32_0 : i32, i32, i32
  }
}

</mosaic_0001>

<bundles_post_ra>
// kernel: tpu_custom_call.1
= control target key start
LH: loop header
LB: loop body
LE: loop exit
PB: predicated region body
PF: predicated region fallthrough
CT: control target
= control target key end

     0   :  { %11 = vsyncpa [#allocation5], 0  ;;  %s1393_s0 = inlined_call_operand.vmem [shape: f32[2,8,32], index: 0, kind: input, shape index: {}]   ;;  %s1394_s1 = inlined_call_operand.vmem [shape: f32[2,8,1], index: 1, kind: input, shape index: {}]   ;;  %s1395_s2 = inlined_call_operand.hbm [shape: bf16[2,3,32,32], index: 2, kind: input, shape index: {}]   ;;  %s1396_s3 = inlined_call_operand.vmem [shape: f32[2,1,32], index: 3, kind: input, shape index: {}]   ;;  %s1397_s4 = inlined_call_operand.hbm [shape: bf16[2,3,32,32], index: 4, kind: input, shape index: {}]   ;;  %s1398_s5 = inlined_call_operand.vmem [shape: f32[2,1,32], index: 5, kind: input, shape index: {}]   ;;  %s1399_s6 = inlined_call_operand.hbm [shape: bf16[2,8,32], index: 6, kind: output, shape index: {}]  }
   0x1   :  { %12 = vsyncpa [#allocation8], 0 }
   0x2   :  { %13 = vsyncpa [#allocation6], 0  ;;  %s1206_s21 = smov [#allocation4]  }
   0x3   :  { %s23_s22 = sshll.u32 %s1206_s21, 4  ;;  %s24_s22 = int_to_ptr.vmem [resolvable:$true] %s23_s22 }
   0x4   :  { %s1148_s23 = scalar_lea.vmem %s24_s22, 1536  ;;  %p1153_p1 = scmp.lt.s32.totalorder %s24_s22, %s24_s22 }
   0x5   :  { %p1149_p0 = scmp.ne.s32.totalorder %s24_s22, %s1148_s23  ;;  %p1154_p2 = scmp.lt.s32.totalorder %s1148_s23, %s1148_s23 }
   0x7   :  { %p1155_p3 = por %p1154_p2, %p1153_p1 }
   0x9   :  { %p1156_p4 = pnand %p1155_p3, %p1149_p0 }
   0xb   :  { %1159 = shalt.err (!%p1156_p4)
}
   0xc   :  { %s1207_s24 = smov 64   ;;  %s1208_s25 = smov 4  }
   0xd   :  { %29 = dma.hbm_to_vmem [thread:$0]  %s1395_s2, 1536, %s24_s22, [#allocation5], %s1207_s24, %s1207_s24, %s1208_s25  }
   0xe   :  { %s1209_s28 = smov [#allocation7]  }
   0xf   :  { %s37_s29 = sshll.u32 %s1209_s28, 4  ;;  %s38_s29 = int_to_ptr.vmem [resolvable:$true] %s37_s29 }
  0x10   :  { %s1168_s30 = scalar_lea.vmem %s38_s29, 1536  ;;  %p1173_p6 = scmp.lt.s32.totalorder %s38_s29, %s38_s29 }
  0x11   :  { %p1169_p5 = scmp.ne.s32.totalorder %s38_s29, %s1168_s30  ;;  %p1174_p7 = scmp.lt.s32.totalorder %s1168_s30, %s1168_s30 }
  0x13   :  { %p1175_p8 = por %p1174_p7, %p1173_p6 }
  0x15   :  { %p1176_p9 = pnand %p1175_p8, %p1169_p5 }
  0x17   :  { %1179 = shalt.err (!%p1176_p9)
}
  0x18   :  { %43 = dma.hbm_to_vmem [thread:$0]  %s1397_s4, 1536, %s38_s29, [#allocation8], %s1207_s24, %s1207_s24, %s1208_s25  }
  0x19   :  { %1200 = dma.done.wait [#allocation5], 1536  }
  0x1a   :  { %1201 = vsyncadd [#allocation5], 4294965760 }
  0x1b   :  { %1202 = dma.done.wait [#allocation8], 1536  }
  0x1c   :  { %1203 = vsyncadd [#allocation8], 4294965760  ;;  %v1210_v0 = vmov 0   ;;  %vm53_vm0 = vcmask 261120   ;;  %v1211_v1 = vmov 0.0   ;;  %v58_v2 = vld [vmem:[%s1394_s1] sm:$0xff] }
  0x1d   :  { %1115 = vset.pattern.permute.xlu0 %v1210_v0  ;;  %1011 = vmatprep.subr.bf16.mxu0 %v1211_v1  ;;  %54 = vst.msk [vmem:[#allocation2] sm:$0xff] %vm53_vm0, %v1211_v1  ;;  %55 = vst.msk [vmem:[#allocation2 + $0x10] sm:$0xff] %vm53_vm0, %v1211_v1  ;;  %v59_v3 = vld [vmem:[%s1394_s1 + $0x8] sm:$0xff]  ;;  %v1116_v4 = vld [vmem:[#allocation4 + $0x18] sm:$0xff]   ;;  %vm1212_vm1 = vmmov 0   ;;  %vm912_vm2 = vcmask 257024  }
  0x1e   :  { %56 = vst.msk [vmem:[#allocation3] sm:$0xff] %vm53_vm0, %v1211_v1  ;;  %57 = vst.msk [vmem:[#allocation3 + $0x10] sm:$0xff] %vm53_vm0, %v1211_v1  ;;  %1019 = vmatprep.subr.bf16.mxu1 %v1211_v1  ;;  %64 = vperm.xlu0 %1115, %v58_v2   ;;  %v1117_v5 = vld [vmem:[#allocation4 + $0x8] sm:$0xff]   ;;  %v1118_v6 = vld [vmem:[#allocation4 + $0x10] sm:$0xff]   ;;  %s1213_s20 = smov [#allocation9]  }
  0x1f   :  { %1015 = vmatprep.mubr.msk.bf16.mxu0 %vm1212_vm1, %v1211_v1  ;;  %1023 = vmatprep.mubr.msk.bf16.mxu1 %vm1212_vm1, %v1211_v1  ;;  %v1119_v7 = vld [vmem:[#allocation4] sm:$0xff]   ;;  %v61_v11 = vld [vmem:[%s1393_s0 + $0x8] sm:$0xff]  ;;  %v1122_v25 = vld [vmem:[#allocation7 + $0x18] sm:$0xff]  }
  0x20   :  { %1012 = vmatpush3.bf16.msra.mxu0 %v1116_v4  ;;  %1020 = vmatpush3.bf16.msra.mxu1 %v1117_v5  ;;  %v60_v8 = vld [vmem:[%s1393_s0] sm:$0xff]  ;;  %v1120_v15 = vld [vmem:[#allocation4 + $0x28] sm:$0xff]   ;;  %v1124_v27 = vld [vmem:[#allocation7 + $0x10] sm:$0xff]  }
  0x21   :  { %1013 = vmatprep.subr.bf16.mxu0 %v1211_v1  ;;  %1021 = vmatprep.subr.bf16.mxu1 %v1211_v1  ;;  %v1121_v21 = vld [vmem:[#allocation4 + $0x20] sm:$0xff]   ;;  %v1123_v26 = vld [vmem:[#allocation7 + $0x8] sm:$0xff]   ;;  %v1129_v62 = vld [vmem:[#allocation4 + $0x38] sm:$0xff]  }
  0x22   :  { %69 = vperm.xlu0 %1115, %v59_v3   ;;  %v1125_v28 = vld [vmem:[#allocation7] sm:$0xff]   ;;  %v1126_v51 = vld [vmem:[#allocation7 + $0x28] sm:$0xff]   ;;  %v1131_v0 = vld [vmem:[#allocation4 + $0x30] sm:$0xff]  }
  0x23   :  { %v942_v39 = vld [vmem:[%s1396_s3] ss:$0 sm:$0xff]  ;;  %v1128_v61 = vld [vmem:[#allocation4 + $0x48] sm:$0xff]  }
  0x24   :  { %1014 = vmatpush3.bf16.msra.mxu0 %v1118_v6  ;;  %1022 = vmatpush3.bf16.msra.mxu1 %v1119_v7  ;;  %v1127_v57 = vld [vmem:[#allocation7 + $0x20] sm:$0xff]  }
  0x25   :  { %1027 = vmatprep.subr.bf16.mxu0 %v1211_v1  ;;  %1035 = vmatprep.subr.bf16.mxu1 %v1211_v1  ;;  %v1130_v63 = vld [vmem:[#allocation4 + $0x40] sm:$0xff]  }
  0x99   :  { %v1288_v9 = vpop.permute.xlu0 %64 }
  0x9a   :  { %v1291_v10 = vmul.f32 %v1288_v9, %v60_v8 }
  0x9c   :  { %74 = vst.msk [vmem:[#allocation2 + $0x8] sm:$0xff] %vm53_vm0, %v1291_v10 }
  0x9d   :  { %v1298_v12 = vpop.permute.xlu0 %69 }
  0x9e   :  { %v1301_v13 = vmul.f32 %v1298_v12, %v61_v11 }
  0xa0   :  { %75 = vst.msk [vmem:[#allocation2 + $0x18] sm:$0xff] %vm53_vm0, %v1301_v13 }
  0xa3   :  { %v83_v14 = vld [vmem:[#allocation2 + $0x7] sm:$0xff] }
  0xa4   :  { %v76_v17 = vld [vmem:[#allocation2 + $0x6] sm:$0xff] }
  0xa5   :  { %v203_v23 = vld [vmem:[#allocation2 + $0x8] sm:$0xff] }
  0xa7   :  { %v84_v16 = vld [vmem:[#allocation2 + $0x17] sm:$0xff] }
  0xa8   :  { %v77_v18 = vld [vmem:[#allocation2 + $0x16] sm:$0xff]  ;;  %v85_v19 = vpack.c.bf16 %v84_v16, %v83_v14  ;;  %v952_v16 = vld [vmem:[%s1398_s5] ss:$0 sm:$0xff] }
  0xa9   :  { %v78_v20 = vpack.c.bf16 %v77_v18, %v76_v17  ;;  %v204_v22 = vld [vmem:[#allocation2 + $0x18] sm:$0xff] }
  0xaa   :  { %1016 = vmatmul.mubr.msk.bf16.vlgmr.msra.gmra.mxu0 %vm53_vm0, %v85_v19  ;;  %v205_v24 = vpack.c.bf16 %v204_v22, %v203_v23 }
  0xab   :  { %1024 = vmatmul.mubr.msk.bf16.vlgmr.msra.gmra.mxu1 %vm53_vm0, %v78_v20  ;;  %1028 = vmatpush3.bf16.msra.mxu0 %v1120_v15 }
  0xac   :  { %1031 = vmatprep.mubr.msk.bf16.mxu0 %vm1212_vm1, %v1211_v1  ;;  %1029 = vmatprep.subr.bf16.mxu0 %v1211_v1 }
  0xad   :  { %1039 = vmatprep.mubr.msk.bf16.mxu1 %vm1212_vm1, %v1211_v1  ;;  %1036 = vmatpush3.bf16.msra.mxu1 %v1122_v25 }
  0xae   :  { %1037 = vmatprep.subr.bf16.mxu1 %v1211_v1 }
  0xaf   :  { %1030 = vmatpush3.bf16.msra.mxu0 %v1121_v21 }
  0xb0   :  { %1043 = vmatprep.subr.bf16.mxu0 %v1211_v1 }
  0xb1   :  { %1038 = vmatpush3.bf16.msra.mxu1 %v1124_v27 }
  0xb2   :  { %1032 = vmatmul.mubr.msk.bf16.vlgmr.msra.gmra.mxu0 %vm53_vm0, %v205_v24  ;;  %1051 = vmatprep.subr.bf16.mxu1 %v1211_v1 }
  0xb3   :  { %1047 = vmatprep.mubr.msk.bf16.mxu0 %vm1212_vm1, %v1211_v1  ;;  %1044 = vmatpush3.bf16.msra.mxu0 %v1123_v26 }
  0xb4   :  { %1045 = vmatprep.subr.bf16.mxu0 %v1211_v1 }
  0xb7   :  { %1046 = vmatpush3.bf16.msra.mxu0 %v1125_v28 }
  0xb8   :  { %1059 = vmatprep.subr.bf16.mxu0 %v1211_v1 }
 0x16a   :  { %v140_v29 = vpop.f32.mrf.mxu0 }
 0x16b   :  { %v196_v30 = vpop.f32.mrf.mxu1 }
 0x16c   :  { %v1017_v31 = vpop.f32.mrf.mxu0  ;;  %v197_v37 = vadd.f32 %v196_v30, %v140_v29 }
 0x16d   :  { %v1025_v32 = vpop.f32.mrf.mxu1 }
 0x16e   :  { %v143_v33 = vpop.f32.mrf.mxu0  ;;  %v1132_v32 = vld [vmem:[#allocation4 + $0x58] sm:$0xff]  }
 0x16f   :  { %v199_v34 = vpop.f32.mrf.mxu1 }
 0x170   :  { %v1018_v35 = vpop.f32.mrf.mxu0  ;;  %v200_v42 = vadd.f32 %v199_v34, %v143_v33 }
 0x171   :  { %v1026_v36 = vpop.f32.mrf.mxu1 }
 0x172   :  { %v260_v38 = vpop.f32.mrf.mxu0 }
 0x173   :  { %v267_v40 = vadd.f32 %v260_v38, %v197_v37  ;;  %v1133_v37 = vld [vmem:[#allocation4 + $0x50] sm:$0xff]  }
 0x174   :  { %v1033_v41 = vpop.f32.mrf.mxu0 }
 0x175   :  { %v276_v43 = vadd.f32 %v942_v39, %v267_v40  ;;  %v1134_v40 = vld [vmem:[#allocation7 + $0x48] sm:$0xff]   ;;  %v1135_v41 = vld [vmem:[#allocation7 + $0x38] sm:$0xff]  }
 0x176   :  { %v263_v44 = vpop.f32.mrf.mxu0 }
 0x177   :  { %v278_v45 = vmax.f32 %v276_v43, 0.0  ;;  %v268_v46 = vadd.f32 %v263_v44, %v200_v42  ;;  %v1136_v42 = vld [vmem:[#allocation7 + $0x40] sm:$0xff]   ;;  %v1137_v43 = vld [vmem:[#allocation7 + $0x30] sm:$0xff]  }
 0x178   :  { %v1034_v47 = vpop.f32.mrf.mxu0  ;;  %v700_v44 = vld [vmem:[#allocation3] sm:$0xff] }
 0x179   :  { %280 = vst.msk [vmem:[#allocation3 + $0x8] sm:$0xff] %vm53_vm0, %v278_v45  ;;  %v277_v48 = vadd.f32 %v942_v39, %v268_v46  ;;  %v701_v45 = vld [vmem:[#allocation3 + $0x10] sm:$0xff] }
 0x17a   :  { %v702_v46 = vpack.c.bf16 %v701_v45, %v700_v44 }
 0x17b   :  { %v279_v49 = vmax.f32 %v277_v48, 0.0 }
 0x17d   :  { %281 = vst.msk [vmem:[#allocation3 + $0x18] sm:$0xff] %vm53_vm0, %v279_v49 }
 0x180   :  { %v289_v50 = vld [vmem:[#allocation3 + $0x6] sm:$0xff] }
 0x181   :  { %v282_v53 = vld [vmem:[#allocation3 + $0x4] sm:$0xff] }
 0x182   :  { %v409_v59 = vld [vmem:[#allocation3 + $0x8] sm:$0xff] }
 0x184   :  { %v290_v52 = vld [vmem:[#allocation3 + $0x16] sm:$0xff] }
 0x185   :  { %v283_v54 = vld [vmem:[#allocation3 + $0x14] sm:$0xff]  ;;  %v291_v55 = vpack.c.bf16 %v290_v52, %v289_v50 }
 0x186   :  { %v284_v56 = vpack.c.bf16 %v283_v54, %v282_v53  ;;  %v410_v58 = vld [vmem:[#allocation3 + $0x18] sm:$0xff] }
 0x187   :  { %1040 = vmatmul.mubr.msk.bf16.vlgmr.msra.gmra.mxu1 %vm53_vm0, %v291_v55  ;;  %v411_v60 = vpack.c.bf16 %v410_v58, %v409_v59 }
 0x188   :  { %1048 = vmatmul.mubr.msk.bf16.vlgmr.msra.gmra.mxu0 %vm53_vm0, %v284_v56  ;;  %1052 = vmatpush3.bf16.msra.mxu1 %v1126_v51 }
 0x189   :  { %1055 = vmatprep.mubr.msk.bf16.mxu1 %vm1212_vm1, %v1211_v1  ;;  %1053 = vmatprep.subr.bf16.mxu1 %v1211_v1 }
 0x18a   :  { %1063 = vmatprep.mubr.msk.bf16.mxu0 %vm1212_vm1, %v1211_v1  ;;  %1060 = vmatpush3.bf16.msra.mxu0 %v1128_v61 }
 0x18b   :  { %1061 = vmatprep.subr.bf16.mxu0 %v1211_v1 }
 0x18c   :  { %1054 = vmatpush3.bf16.msra.mxu1 %v1127_v57  ;;  %v963_v57 = vld [vmem:[%s1396_s3 + $0x1] ss:$0 sm:$0xff] }
 0x18d   :  { %1067 = vmatprep.subr.bf16.mxu1 %v1211_v1 }
 0x18e   :  { %1062 = vmatpush3.bf16.msra.mxu0 %v1130_v63 }
 0x18f   :  { %1056 = vmatmul.mubr.msk.bf16.vlgmr.msra.gmra.mxu1 %vm53_vm0, %v411_v60  ;;  %1075 = vmatprep.subr.bf16.mxu0 %v1211_v1 }
 0x190   :  { %1071 = vmatprep.mubr.msk.bf16.mxu1 %vm1212_vm1, %v1211_v1  ;;  %1068 = vmatpush3.bf16.msra.mxu1 %v1129_v62 }
 0x191   :  { %1069 = vmatprep.subr.bf16.mxu1 %v1211_v1 }
 0x194   :  { %1070 = vmatpush3.bf16.msra.mxu1 %v1131_v0 }
 0x195   :  { %1083 = vmatprep.subr.bf16.mxu1 %v1211_v1 }
 0x247   :  { %v346_v2 = vpop.f32.mrf.mxu1 }
 0x248   :  { %v402_v3 = vpop.f32.mrf.mxu0 }
 0x249   :  { %v1041_v4 = vpop.f32.mrf.mxu1  ;;  %v403_v14 = vadd.f32 %v402_v3, %v346_v2 }
 0x24a   :  { %v1049_v5 = vpop.f32.mrf.mxu0 }
 0x24b   :  { %v349_v6 = vpop.f32.mrf.mxu1 }
 0x24c   :  { %v405_v7 = vpop.f32.mrf.mxu0 }
 0x24d   :  { %v1042_v8 = vpop.f32.mrf.mxu1  ;;  %v406_v19 = vadd.f32 %v405_v7, %v349_v6  ;;  %v1138_v7 = vld [vmem:[#allocation7 + $0x58] sm:$0xff]  }
 0x24e   :  { %v1050_v11 = vpop.f32.mrf.mxu0 }
 0x24f   :  { %v466_v15 = vpop.f32.mrf.mxu1  ;;  %v1139_v11 = vld [vmem:[#allocation7 + $0x50] sm:$0xff]  }
 0x250   :  { %v473_v17 = vadd.f32 %v466_v15, %v403_v14 }
 0x251   :  { %v1057_v18 = vpop.f32.mrf.mxu1 }
 0x252   :  { %v482_v20 = vadd.f32 %v952_v16, %v473_v17 }
 0x253   :  { %v469_v21 = vpop.f32.mrf.mxu1 }
 0x254   :  { %v484_v22 = vmax.f32 %v482_v20, 0.0  ;;  %v474_v23 = vadd.f32 %v469_v21, %v406_v19 }
 0x255   :  { %v1058_v24 = vpop.f32.mrf.mxu1 }
 0x256   :  { %v486_v25 = vadd.f32 %v484_v22, %v1291_v10  ;;  %v483_v26 = vadd.f32 %v952_v16, %v474_v23 }
 0x258   :  { %v1345_v27 = vmul.f32 %v486_v25, %v1288_v9  ;;  %v485_v28 = vmax.f32 %v483_v26, 0.0 }
 0x25a   :  { %490 = vst.msk [vmem:[#allocation2 + $0x8] sm:$0xff] %vm53_vm0, %v1345_v27  ;;  %v487_v29 = vadd.f32 %v485_v28, %v1301_v13 }
 0x25c   :  { %v1351_v30 = vmul.f32 %v487_v29, %v1298_v12 }
 0x25e   :  { %491 = vst.msk [vmem:[#allocation2 + $0x18] sm:$0xff] %vm53_vm0, %v1351_v30 }
 0x261   :  { %v500_v31 = vld [vmem:[#allocation2 + $0x6] sm:$0xff] }
 0x262   :  { %v492_v10 = vld [vmem:[#allocation2 + $0x4] sm:$0xff] }
 0x263   :  { %v620_v38 = vld [vmem:[#allocation2 + $0x8] sm:$0xff] }
 0x265   :  { %v501_v33 = vld [vmem:[#allocation2 + $0x16] sm:$0xff] }
 0x266   :  { %v493_v34 = vld [vmem:[#allocation2 + $0x14] sm:$0xff]  ;;  %v502_v35 = vpack.c.bf16 %v501_v33, %v500_v31 }
 0x267   :  { %v494_v36 = vpack.c.bf16 %v493_v34, %v492_v10  ;;  %v621_v13 = vld [vmem:[#allocation2 + $0x18] sm:$0xff] }
 0x268   :  { %1064 = vmatmul.mubr.msk.bf16.vlgmr.msra.gmra.mxu0 %vm53_vm0, %v502_v35  ;;  %v622_v39 = vpack.c.bf16 %v621_v13, %v620_v38 }
 0x269   :  { %1072 = vmatmul.mubr.msk.bf16.vlgmr.msra.gmra.mxu1 %vm53_vm0, %v494_v36  ;;  %1076 = vmatpush3.bf16.msra.mxu0 %v1132_v32 }
 0x26a   :  { %1079 = vmatprep.mubr.msk.bf16.mxu0 %vm1212_vm1, %v1211_v1  ;;  %1077 = vmatprep.subr.bf16.mxu0 %v1211_v1 }
 0x26b   :  { %1087 = vmatprep.mubr.msk.bf16.mxu1 %vm1212_vm1, %v1211_v1  ;;  %1084 = vmatpush3.bf16.msra.mxu1 %v1134_v40 }
 0x26c   :  { %1085 = vmatprep.subr.bf16.mxu1 %v1211_v1 }
 0x26d   :  { %1078 = vmatpush3.bf16.msra.mxu0 %v1133_v37 }
 0x26e   :  { %1091 = vmatprep.subr.bf16.mxu0 %v1211_v1 }
 0x26f   :  { %1086 = vmatpush3.bf16.msra.mxu1 %v1136_v42 }
 0x270   :  { %1080 = vmatmul.mubr.msk.bf16.vlgmr.msra.gmra.mxu0 %vm53_vm0, %v622_v39  ;;  %1099 = vmatprep.subr.bf16.mxu1 %v1211_v1 }
 0x271   :  { %1095 = vmatprep.mubr.msk.bf16.mxu0 %vm1212_vm1, %v1211_v1  ;;  %1092 = vmatpush3.bf16.msra.mxu0 %v1135_v41 }
 0x272   :  { %1093 = vmatprep.subr.bf16.mxu0 %v1211_v1 }
 0x275   :  { %1094 = vmatpush3.bf16.msra.mxu0 %v1137_v43 }
 0x278   :  { %1096 = vmatmul.mubr.msk.bf16.vlgmr.msra.gmra.mxu0 %vm53_vm0, %v702_v46 }
 0x328   :  { %v557_v47 = vpop.f32.mrf.mxu0 }
 0x329   :  { %v613_v48 = vpop.f32.mrf.mxu1 }
 0x32a   :  { %v1065_v49 = vpop.f32.mrf.mxu0  ;;  %v614_v55 = vadd.f32 %v613_v48, %v557_v47 }
 0x32b   :  { %v1073_v50 = vpop.f32.mrf.mxu1 }
 0x32c   :  { %v560_v51 = vpop.f32.mrf.mxu0 }
 0x32d   :  { %v616_v52 = vpop.f32.mrf.mxu1 }
 0x32e   :  { %v1066_v53 = vpop.f32.mrf.mxu0  ;;  %v617_v60 = vadd.f32 %v616_v52, %v560_v51 }
 0x32f   :  { %v1074_v54 = vpop.f32.mrf.mxu1 }
 0x330   :  { %v677_v56 = vpop.f32.mrf.mxu0 }
 0x331   :  { %v684_v58 = vadd.f32 %v677_v56, %v614_v55 }
 0x332   :  { %v1081_v59 = vpop.f32.mrf.mxu0 }
 0x333   :  { %v694_v61 = vadd.f32 %v963_v57, %v684_v58 }
 0x334   :  { %v680_v62 = vpop.f32.mrf.mxu0 }
 0x335   :  { %v696_v63 = vmax.f32 %v694_v61, 0.0  ;;  %v685_v0 = vadd.f32 %v680_v62, %v617_v60 }
 0x336   :  { %v1082_v2 = vpop.f32.mrf.mxu0 }
 0x337   :  { %698 = vst.msk [vmem:[#allocation3 + $0x8] sm:$0xff] %vm53_vm0, %v696_v63  ;;  %v695_v3 = vadd.f32 %v963_v57, %v685_v0 }
 0x338   :  { %v821_v17 = vpop.f32.mrf.mxu0 }
 0x339   :  { %v697_v4 = vmax.f32 %v695_v3, 0.0 }
 0x33a   :  { %v1097_v18 = vpop.f32.mrf.mxu0 }
 0x33b   :  { %699 = vst.msk [vmem:[#allocation3 + $0x18] sm:$0xff] %vm53_vm0, %v697_v4 }
 0x33c   :  { %v824_v19 = vpop.f32.mrf.mxu0 }
 0x33e   :  { %v708_v5 = vld [vmem:[#allocation3 + $0x4] sm:$0xff]  ;;  %v1098_v20 = vpop.f32.mrf.mxu0 }
 0x33f   :  { %v828_v15 = vld [vmem:[#allocation3 + $0x8] sm:$0xff] }
 0x342   :  { %v709_v6 = vld [vmem:[#allocation3 + $0x14] sm:$0xff] }
 0x343   :  { %v710_v8 = vpack.c.bf16 %v709_v6, %v708_v5  ;;  %v829_v14 = vld [vmem:[#allocation3 + $0x18] sm:$0xff] }
 0x344   :  { %v830_v16 = vpack.c.bf16 %v829_v14, %v828_v15 }
 0x345   :  { %1088 = vmatmul.mubr.msk.bf16.vlgmr.msra.gmra.mxu1 %vm53_vm0, %v710_v8 }
 0x346   :  { %1100 = vmatpush3.bf16.msra.mxu1 %v1138_v7  ;;  %1103 = vmatprep.mubr.msk.bf16.mxu1 %vm1212_vm1, %v1211_v1 }
 0x347   :  { %1101 = vmatprep.subr.bf16.mxu1 %v1211_v1  ;;  %v974_v1 = vld [vmem:[%s1398_s5 + $0x1] ss:$0 sm:$0xff]  ;;  %s920_s5 = sshll.u32 %s1213_s20, 4  ;;  %s921_s5 = int_to_ptr.vmem [resolvable:$true] %s920_s5 }
 0x348   :  { %s1180_s21 = scalar_lea.vmem %s921_s5, 128  ;;  %p1185_p11 = scmp.lt.s32.totalorder %s921_s5, %s921_s5 }
 0x349   :  { %p1181_p10 = scmp.ne.s32.totalorder %s921_s5, %s1180_s21  ;;  %p1186_p12 = scmp.lt.s32.totalorder %s1180_s21, %s1180_s21 }
 0x34a   :  { %1102 = vmatpush3.bf16.msra.mxu1 %v1139_v11 }
 0x34b   :  { %p1187_p13 = por %p1186_p12, %p1185_p11 }
 0x34d   :  { %1104 = vmatmul.mubr.msk.bf16.vlgmr.msra.gmra.mxu1 %vm53_vm0, %v830_v16  ;;  %p1188_p0 = pnand %p1187_p13, %p1181_p10 }
 0x405   :  { %v765_v21 = vpop.f32.mrf.mxu1 }
 0x406   :  { %v822_v25 = vadd.f32 %v821_v17, %v765_v21 }
 0x407   :  { %v1089_v22 = vpop.f32.mrf.mxu1 }
 0x409   :  { %v768_v23 = vpop.f32.mrf.mxu1 }
 0x40a   :  { %v825_v31 = vadd.f32 %v824_v19, %v768_v23 }
 0x40b   :  { %v1090_v24 = vpop.f32.mrf.mxu1 }
 0x40d   :  { %v885_v26 = vpop.f32.mrf.mxu1 }
 0x40e   :  { %v892_v28 = vadd.f32 %v885_v26, %v822_v25 }
 0x40f   :  { %v1105_v29 = vpop.f32.mrf.mxu1 }
 0x410   :  { %v902_v32 = vadd.f32 %v974_v1, %v892_v28 }
 0x411   :  { %v888_v33 = vpop.f32.mrf.mxu1 }
 0x412   :  { %v904_v10 = vmax.f32 %v902_v32, 0.0  ;;  %v893_v34 = vadd.f32 %v888_v33, %v825_v31 }
 0x413   :  { %v1106_v35 = vpop.f32.mrf.mxu1 }
 0x414   :  { %v906_v36 = vadd.f32 %v904_v10, %v1345_v27  ;;  %v903_v37 = vadd.f32 %v974_v1, %v893_v34 }
 0x416   :  { %v908_v13 = vmul.f32 %v906_v36, %v1288_v9  ;;  %v905_v38 = vmax.f32 %v903_v37, 0.0 }
 0x418   :  { %v910_v39 = vpack.c.bf16 %v908_v13, %v908_v13  ;;  %v907_v40 = vadd.f32 %v905_v38, %v1351_v30 }
 0x41a   :  { %v909_v41 = vmul.f32 %v907_v40, %v1298_v12  ;;  %913 = vst.msk [vmem:[#allocation9] sm:$0xf] %vm912_vm2, %v910_v39 }
 0x41c   :  { %v911_v42 = vpack.c.bf16 %v909_v41, %v909_v41 }
 0x41e   :  { %914 = vst.msk [vmem:[#allocation9 + $0x4] sm:$0xf] %vm912_vm2, %v911_v42 }
 0x41f   :  { %1191 = shalt.err (!%p1188_p0)
}
 0x420   :  { %926 = dma.vmem_to_hbm [thread:$0]  %s921_s5, 128, %s1399_s6, [#allocation6], %s1207_s24, %s1207_s24, %s1208_s25  }
 0x421   :  { %1204 = dma.done.wait [#allocation6], 128  }
 0x422   :  { %1205 = vsyncadd [#allocation6], 4294967168 }
 0x423   :  { %930 = vsyncpa [#allocation5], 1 }
 0x424   :  { %931 = vsyncpa [#allocation8], 1 }
 0x425   :  { %932 = vsyncpa [#allocation6], 1 }

</bundles_post_ra>
